<compile_context>
chip_gen: v6e
topology: v6e:2x2x1
jax: 0.10.0
libtpu: 0.0.40
codegen_flags: <defaults>
</compile_context>

<pallas_src>
import jax
import jax.numpy as jnp
from jax import lax
from jax.experimental import pallas as pl
from jax.experimental.pallas import tpu as pltpu


def linear_kernel(x_ref, w_ref, b_ref, o_ref):
    # x_ref: (TB, K)   activation tile (f32 or bf16)
    # w_ref: (Np, K)   weight, native (out, in) layout, VMEM-resident
    # b_ref: (1, Np)   bias (f32), VMEM-resident
    # o_ref: (TB, Np)  lane-dense output tile
    acc = lax.dot_general(
        x_ref[...], w_ref[...],
        dimension_numbers=(((1,), (1,)), ((), ())),   # contract over K (NT form)
        preferred_element_type=jnp.float32)
    # f32 epilogue (bias add + cast): correct on v5e (no bf16 VPU) and cheap.
    o_ref[...] = (acc + b_ref[...]).astype(o_ref.dtype)


def _pallas_linear(x, weight, bias, *, block_b=1024, mxu_bf16=True):
    B, K = x.shape
    N, Kw = weight.shape
    assert Kw == K
    out_dtype = x.dtype

    # --- one-time layout plumbing (outside the hot loop) -------------------
    # Pad out_features to a lane-dense multiple of 128 (tiny: <= 256 KiB here).
    Np = pl.cdiv(N, 128) * 128
    if Np != N:
        weight = jnp.pad(weight, ((0, Np - N), (0, 0)))
        bias = jnp.pad(bias, (0, Np - N))
    bias2d = bias.reshape(1, Np).astype(jnp.float32)

    # bf16 MXU operands (f32 accumulate). Keep f32 when B < 16 (bf16 min
    # sublane tile is 16) so tiny batches stay exact.
    if mxu_bf16 and B >= 16:
        x_in = x.astype(jnp.bfloat16)
        w_in = weight.astype(jnp.bfloat16)
    else:
        x_in = x
        w_in = weight

    # Batch tile: large (amortize ~0.35 us/step pipeline overhead), but cap at
    # ~ceil(B/2) rounded to 16 so grid >= 2 and the "parallel" axis can use
    # both v7x TensorCores. No padding of x: the last block may be partial;
    # Pallas masks out-of-bounds reads/writes.
    half = ((B + 1) // 2 + 15) // 16 * 16
    TB = min(block_b, half, B)
    grid = (pl.cdiv(B, TB),)

    # Resident (constant-index-map) inputs: single-buffer only if the weight
    # tile is big enough to matter for v7x's 64 MiB VMEM (32 MiB scoped).
    def resident_spec(shape):
        if Np * K * jnp.dtype(w_in.dtype).itemsize > (8 << 20):
            return pl.BlockSpec(shape, lambda i: (0, 0),
                                pipeline_mode=pl.Buffered(1))
        return pl.BlockSpec(shape, lambda i: (0, 0))

    bytes_accessed = (x_in.size * jnp.dtype(x_in.dtype).itemsize
                      + w_in.size * jnp.dtype(w_in.dtype).itemsize
                      + bias2d.size * 4
                      + B * Np * jnp.dtype(out_dtype).itemsize)
    cost = pl.CostEstimate(flops=2 * B * K * Np, transcendentals=0,
                           bytes_accessed=bytes_accessed)

    y = pl.pallas_call(
        linear_kernel,
        out_shape=jax.ShapeDtypeStruct((B, Np), out_dtype),
        grid=grid,
        in_specs=[
            pl.BlockSpec((TB, K), lambda i: (i, 0)),   # x: tiled over batch
            resident_spec((Np, K)),                    # weight: resident
            resident_spec((1, Np)),                    # bias: resident
        ],
        out_specs=pl.BlockSpec((TB, Np), lambda i: (i, 0)),
        compiler_params=pltpu.CompilerParams(
            dimension_semantics=("parallel",)),
        cost_estimate=cost,
    )(x_in, w_in, bias2d)

    # Strip lane padding. (Call this under the consumer's jit so it fuses.)
    return y[:, :N]


def last_layer_forward(x, weight, bias, *, block_b=1024, mxu_bf16=True,
                       force_pallas=False, min_pallas_elems=64 * 1024):
    """y = x @ weight.T + bias, matching torch.nn.Linear.

    x:      (B, in_features)
    weight: (out_features, in_features)   (native PyTorch layout)
    bias:   (out_features,)
    """
    B, K = x.shape
    N, Kw = weight.shape
    assert Kw == K
    Np = pl.cdiv(N, 128) * 128
    if not force_pallas and B * Np < min_pallas_elems:
        # Launch-overhead-bound regime: let XLA's fused dot+bias handle it.
        return jnp.dot(x, weight.T) + bias
    return _pallas_linear(x, weight, bias, block_b=block_b, mxu_bf16=mxu_bf16)


if __name__ == "__main__":
    IN_FEATURES, OUT_FEATURES = 512, 10

    key = jax.random.PRNGKey(0)
    kx, kw, kb, kx2, kx3 = jax.random.split(key, 5)

    # Deterministic synthetic parameters (nn.Linear-like uniform init).
    bound = 1.0 / (IN_FEATURES ** 0.5)
    weight = jax.random.uniform(kw, (OUT_FEATURES, IN_FEATURES),
                                dtype=jnp.float32, minval=-bound, maxval=bound)
    bias = jax.random.uniform(kb, (OUT_FEATURES,),
                              dtype=jnp.float32, minval=-bound, maxval=bound)

    # 1) Module-default size (B=8): gated to the fused XLA path.
    x_small = jax.random.normal(kx, (8, IN_FEATURES), dtype=jnp.float32)
    y_small = jax.block_until_ready(last_layer_forward(x_small, weight, bias))
    ref_small = x_small @ weight.T + bias
    assert y_small.shape == (8, OUT_FEATURES)
    assert jnp.allclose(y_small, ref_small, atol=1e-4, rtol=1e-4)

    # 2) Pallas kernel, f32 MXU operands (tight tolerance), forced past the gate.
    x_mid = jax.random.normal(kx2, (32, IN_FEATURES), dtype=jnp.float32)
    y_mid = jax.block_until_ready(
        last_layer_forward(x_mid, weight, bias, mxu_bf16=False,
                           force_pallas=True))
    ref_mid = x_mid @ weight.T + bias
    assert y_mid.shape == (32, OUT_FEATURES)
    assert jnp.allclose(y_mid, ref_mid, atol=1e-4, rtol=1e-4)

    # 3) Pallas kernel, bf16 MXU path at a size that passes the gate
    #    (TB=512 -> grid=2 so the "parallel" axis can use both v7x cores).
    x_big = jax.random.normal(kx3, (1024, IN_FEATURES), dtype=jnp.float32)
    y_big = jax.block_until_ready(last_layer_forward(x_big, weight, bias))
    ref_big = x_big @ weight.T + bias
    assert y_big.shape == (1024, OUT_FEATURES)
    assert jnp.allclose(y_big, ref_big, atol=3e-2, rtol=3e-2)

    print("KERNEL_OK")
</pallas_src>

<mosaic_0001>
module attributes {stable_mosaic.version = 11 : i64} {
  func.func @linear_kernel(%arg0: i32, %arg1: memref<16x512xf32, #tpu.memory_space<vmem>>, %arg2: memref<128x512xf32, #tpu.memory_space<vmem>>, %arg3: memref<1x128xf32, #tpu.memory_space<vmem>>, %arg4: memref<16x128xf32, #tpu.memory_space<vmem>>) attributes {dimension_semantics = [#tpu.dimension_semantics<parallel>], iteration_bounds = array<i64: 2>, scalar_prefetch = 0 : i64, scratch_operands = 0 : i64, tpu.core_type = #tpu.core_type<tc>, window_params = [{transform_indices = @transform_0, window_bounds = array<i64: 16, 512>}, {pipeline_mode = #tpu.pipeline_mode<synchronous>, transform_indices = @transform_1, window_bounds = array<i64: 128, 512>}, {pipeline_mode = #tpu.pipeline_mode<synchronous>, transform_indices = @transform_2, window_bounds = array<i64: 1, 128>}, {transform_indices = @transform_3, window_bounds = array<i64: 16, 128>}]} {
    %c0 = arith.constant 0 : index
    %c0_0 = arith.constant 0 : index
    %0 = vector.load %arg1[%c0, %c0_0] : memref<16x512xf32, #tpu.memory_space<vmem>>, vector<16x512xf32>
    %c0_1 = arith.constant 0 : index
    %c0_2 = arith.constant 0 : index
    %1 = vector.load %arg2[%c0_1, %c0_2] : memref<128x512xf32, #tpu.memory_space<vmem>>, vector<128x512xf32>
    %cst = arith.constant dense<0.000000e+00> : vector<16x128xf32>
    %2 = tpu.matmul %0, %1, %cst {dimension_numbers = #tpu.dot_dimension_numbers<[1], [1], [0], [0], [0, 0, 1, 0], [], []>} : vector<16x512xf32>, vector<128x512xf32>, vector<16x128xf32> -> vector<16x128xf32>
    %c0_3 = arith.constant 0 : index
    %c0_4 = arith.constant 0 : index
    %3 = vector.load %arg3[%c0_3, %c0_4] : memref<1x128xf32, #tpu.memory_space<vmem>>, vector<1x128xf32>
    %4 = vector.broadcast %3 : vector<1x128xf32> to vector<16x128xf32>
    %5 = arith.addf %2, %4 : vector<16x128xf32>
    %c0_5 = arith.constant 0 : index
    %c0_6 = arith.constant 0 : index
    %6 = vector.load %arg4[%c0_5, %c0_6] : memref<16x128xf32, #tpu.memory_space<vmem>>, vector<16x128xf32>
    tpu.vector_store %arg4[%c0_5, %c0_6], %5 {strides = array<i32>} : memref<16x128xf32, #tpu.memory_space<vmem>>, vector<16x128xf32>,
    return
  }
  func.func @transform_0(%arg0: i32) -> (i32, i32) {
    %c0_i32 = arith.constant 0 : i32
    %c0_i32_0 = arith.constant 0 : i32
    return %arg0, %c0_i32 : i32, i32
  }
  func.func @transform_1(%arg0: i32) -> (i32, i32) {
    %c0_i32 = arith.constant 0 : i32
    %c0_i32_0 = arith.constant 0 : i32
    %c0_i32_1 = arith.constant 0 : i32
    return %c0_i32, %c0_i32_0 : i32, i32
  }
  func.func @transform_2(%arg0: i32) -> (i32, i32) {
    %c0_i32 = arith.constant 0 : i32
    %c0_i32_0 = arith.constant 0 : i32
    %c0_i32_1 = arith.constant 0 : i32
    return %c0_i32, %c0_i32_0 : i32, i32
  }
  func.func @transform_3(%arg0: i32) -> (i32, i32) {
    %c0_i32 = arith.constant 0 : i32
    %c0_i32_0 = arith.constant 0 : i32
    return %arg0, %c0_i32 : i32, i32
  }
}

</mosaic_0001>

<bundles_post_ra>
// kernel: tpu_custom_call.1
= control target key start
LH: loop header
LB: loop body
LE: loop exit
PB: predicated region body
PF: predicated region fallthrough
CT: control target
= control target key end

     0   :  { %8 = vsyncpa [#allocation3], 0  ;;  %s965_s0 = inlined_call_operand.hbm [shape: f32[32,512], index: 0, kind: input, shape index: {}]   ;;  %s966_s1 = inlined_call_operand.hbm [shape: f32[128,512], index: 1, kind: input, shape index: {}]   ;;  %s967_s2 = inlined_call_operand.vmem [shape: f32[1,128], index: 2, kind: input, shape index: {}]   ;;  %s968_s3 = inlined_call_operand.hbm [shape: f32[32,128], index: 3, kind: output, shape index: {}]  }
   0x1   :  { %10 = vsyncpa [#allocation3 + $0x1], 0 }
   0x2   :  { %11 = vsyncpa [#allocation6], 0 }
   0x3   :  { %12 = vsyncpa [#allocation4], 0 }
   0x4   :  { %14 = vsyncpa [#allocation4 + $0x1], 0  ;;  %s768_s12 = smov 0   ;;  %s770_s13 = smov 0  }
   0x5   :  { %s772_s14 = smov 0   ;;  %s774_s15 = smov 0  }
   0x6 LB: > { %s789_s16 = sadd.s32 4294967295, %s739_s15   ;;  %s535_s17 = sadd.s32 4294967294, %s739_s15   ;;  %s739_s15 = sphi %s774_s15, %s990_s15   ;;  %s735_s14 = sphi %s772_s14, %s989_s14   ;;  %s731_s13 = sphi %s770_s13, %s988_s13   ;;  %s727_s12 = sphi %s768_s12, %s987_s12  }
   0x7   : > { %p40_p0 = scmp.ne.s32.totalorder %s731_s13, %s727_s12  ;;  %p969_p1 = scmp.eq.s32.totalorder %s789_s16, 0 }
   0x8   : > { %p112_p3 = scmp.eq.s32.totalorder %s535_s17, 1  ;;  %p536_p5 = scmp.ge.s32.totalorder %s739_s15, 1 }
   0x9   : > { %p798_p4 = por %p969_p1, %p40_p0  ;;  %p119_p7 = scmp.lt.s32.totalorder %s739_s15, 3 }
   0xa   : > { %p803_p6 = por %p112_p3, %p40_p0  ;;  %s741_s21 = smov [#allocation5]  }
   0xb   : > { %s973_s18 = scalar_select %p798_p4, 1, 0 }
   0xc   : > { %s974_s19 = scalar_select %p803_p6, 1, 0 }
   0xd   : > { %p808_p8 = pnand %p536_p5, %p119_p7  ;;  %s131_s22 = sshll.u32 %s741_s21, 4  ;;  %s132_s22 = int_to_ptr.vmem [resolvable:$true] %s131_s22 }
   0xe   : > { %s822_s24 = sadd.s32 1, %s739_s15   ;;  %s27_s25 = sadd.s32 1, %s735_s14 }
   0xf   : > { %s975_s20 = scalar_select %p808_p8, 1, 0 }
  0x10   : > { %p564_p9 = pneg %p808_p8  ;;  %s24_s26 = ssub.s32 %s739_s15, %s822_s24 }
  0x11   : > { %s628_s27 = scalar_lea.vmem %s132_s22, 8192  ;;  %p636_p5 = scmp.lt.s32.totalorder %s132_s22, %s132_s22 }
  0x12   : > { %p817_p11 = pnand %p564_p9, %p969_p1  ;;  %p629_p13 = scmp.ne.s32.totalorder %s132_s22, %s628_s27 }
  0x13   : > { %p637_p7 = scmp.lt.s32.totalorder %s628_s27, %s628_s27 }
  0x14   : > { %p619_p12 = pneg %p817_p11 }
  0x15   : > { %p638_p10 = por %p637_p7, %p636_p5 }
  0x16   : > { %p631_p0 = pnand %p629_p13, %p619_p12 }
  0x18   : > { %p632_p3 = pneg %p631_p0 }
  0x1a   : > { %p639_p2 = pnand %p638_p10, %p632_p3 }
  0x1c   : > { %642 = shalt.err (!%p639_p2)
}
  0x1d   : > { %s742_s28 = smov 512   ;;  %s743_s29 = smov 32  }
  0x1e   : > { %567 = dma.hbm_to_vmem [thread:$0]  (!%p817_p11), %s966_s1, 8192, %s132_s22, [#allocation6], %s742_s28, %s742_s28, %s743_s29  }
  0x1f   : > { %p25_p2 = scmp.eq.s32.totalorder %s24_s26, 0  ;;  %p34_p9 = scmp.ne.s32.totalorder %s735_s14, %s731_s13 }
  0x20   : > { %p35_p10 = scmp.eq.s32.totalorder %s739_s15, 0  ;;  %p577_p12 = scmp.lt.s32.totalorder %s739_s15, 2 }
  0x21   : > { %s842_s5 = scalar_select %p25_p2, %s735_s14, %s27_s25  }
  0x22   : > { %p36_p13 = por %p35_p10, %p34_p9  ;;  %p977_p0 = scmp.eq.s32.totalorder %s789_s16, 1 }
  0x23   : > { %s148_s7 = sand.u32 1, %s735_s14   ;;  %s554_s8 = sshll.u32 %s739_s15, 10 }
  0x24   : > { %p846_p3 = por %p977_p0, %p34_p9  ;;  %s539_s9 = sshll.u32 %s148_s7, 6 }
  0x25   : > { %s855_s17 = scalar_lea.hbm %s965_s0, %s554_s8  ;;  %s152_s21 = scalar_lea.vmem [#allocation2], %s539_s9 }
  0x26   : > { %s978_s6 = scalar_select %p846_p3, 1, 0 }
  0x27   : > { %s160_s22 = sshll.u32 %s152_s21, 4  ;;  %p857_p11 = pnand %p577_p12, %p36_p13  ;;  %s861_s22 = int_to_ptr.vmem [resolvable:$true] %s160_s22 }
  0x28   : > { %s863_s25 = scalar_lea.sflag [#allocation3], %s148_s7  ;;  %s643_s26 = scalar_lea.hbm %s855_s17, 1024 }
  0x29   : > { %p644_p5 = scmp.ne.s32.totalorder %s855_s17, %s643_s26  ;;  %p645_p7 = pneg %p857_p11 }
  0x2a   : > { %s648_s4 = scalar_lea.hbm %s965_s0, 2048  ;;  %p649_p10 = scmp.lt.s32.totalorder %s855_s17, %s965_s0 }
  0x2b   : > { %p646_p2 = pnand %p645_p7, %p644_p5  ;;  %p650_p12 = scmp.lt.s32.totalorder %s648_s4, %s643_s26 }
  0x2d   : > { %p647_p9 = pneg %p646_p2  ;;  %p651_p13 = por %p650_p12, %p649_p10 }
  0x2f   : > { %p652_p0 = pnand %p651_p13, %p647_p9 }
  0x31   : > { %655 = shalt.err (!%p652_p0)
}
  0x32   : > { %s656_s7 = scalar_lea.vmem %s861_s22, 1024  ;;  %s744_s10 = smov [#allocation2]  }
  0x33   : > { %p657_p1 = scmp.ne.s32.totalorder %s861_s22, %s656_s7  ;;  %s661_s11 = sshll.u32 %s744_s10, 4  ;;  %s662_s11 = int_to_ptr.vmem [resolvable:$false] %s661_s11 }
  0x34   : > { %s663_s21 = scalar_lea.vmem %s662_s11, 2048  ;;  %p664_p2 = scmp.lt.s32.totalorder %s861_s22, %s662_s11 }
  0x35   : > { %p659_p6 = pnand %p657_p1, %p645_p7  ;;  %p665_p3 = scmp.lt.s32.totalorder %s663_s21, %s656_s7 }
  0x37   : > { %p660_p5 = pneg %p659_p6  ;;  %p666_p4 = por %p665_p3, %p664_p2 }
  0x39   : > { %p667_p8 = pnand %p666_p4, %p660_p5 }
  0x3b   : > { %670 = shalt.err (!%p667_p8)
}
  0x3c   : > { %571 = dma.hbm_to_vmem [thread:$0]  (!%p857_p11), %s855_s17, 1024, %s861_s22, %s863_s25, %s742_s28, %s742_s28, %s743_s29  }
  0x3d   : > { %p980_p1 = scmp.ne.s32.totalorder %s975_s20, 0 }
  0x3e   : > { %s890_s26 = sand.u32 (!%p980_p1), 1, %s731_s13   ;;  %p981_p4 = scmp.ne.s32.totalorder (!%p980_p1), %s973_s18, 0 }
  0x3f   : > { %172 = sbr.rel (%p980_p1) target bundleno = 352 (0x160), region = 32  ;;  %s544_s27 = sshll.u32 (!%p980_p1), %s890_s26, 6 }
  0x40   : > { %s175_s30 = scalar_lea.sflag (!%p980_p1), [#allocation3], %s890_s26  ;;  %s894_s4 = scalar_lea.vmem (!%p980_p1), [#allocation2], %s544_s27 }
  0x44   : > { %714 = dma.done.wait (%p981_p4), %s175_s30, 1024  }
  0x45   : > { %716 = vsyncadd (%p981_p4), %s175_s30, 4294966272  ;;  %p982_p6 = scmp.eq.s32.totalorder %s789_s16, 0 }
  0x47   : > { %718 = dma.done.wait (%p982_p6), [#allocation6], 8192   ;;  %p983_p8 = pmov %p982_p6 }
  0x48   : > { %v276_v0 = vld [vmem:[#allocation5 + $0x1e8] sm:$0xff]  ;;  %v278_v1 = vld [vmem:[#allocation5 + $0x1f8] sm:$0xff]  ;;  %v275_v2 = vld [vmem:[#allocation5 + $0x1e0] sm:$0xff]  ;;  %s546_s28 = sshll.u32 %s890_s26, 4  ;;  %s555_s22 = sshll.u32 %s789_s16, 8 }
  0x49   : > { %720 = vsyncadd (%p983_p8), [#allocation6], 4294959104  ;;  %286 = vmatprep.subr.mxu0 %v276_v0  ;;  %361 = vmatprep.subr.mxu1 %v278_v1  ;;  %v277_v3 = vld [vmem:[#allocation5 + $0x1f0] sm:$0xff]  ;;  %v272_v4 = vld [vmem:[#allocation5 + $0x1c8] sm:$0xff]  ;;  %s204_s29 = scalar_lea.vmem [#allocation7], %s546_s28  ;;  %s922_s8 = scalar_lea.hbm %s968_s3, %s555_s22 }
  0x4a   : > { %v274_v5 = vld [vmem:[#allocation5 + $0x1d8] sm:$0xff]  ;;  %287 = vmatpush1.xpose.msra.mxu0 %v275_v2  ;;  %362 = vmatpush1.xpose.msra.mxu1 %v277_v3  ;;  %v271_v6 = vld [vmem:[#allocation5 + $0x1c0] sm:$0xff]  ;;  %v273_v7 = vld [vmem:[#allocation5 + $0x1d0] sm:$0xff]  ;;  %s452_s17 = sshll.u32 %s204_s29, 4  ;;  %s439_s9 = scalar_lea.sflag [#allocation4], %s890_s26  ;;  %s917_s17 = int_to_ptr.vmem [resolvable:$true] %s452_s17 }
  0x4b   : > { %288 = vmatprep.subr.mxu0 %v272_v4  ;;  %363 = vmatprep.subr.mxu1 %v274_v5  ;;  %v268_v8 = vld [vmem:[#allocation5 + $0x1a8] sm:$0xff]  ;;  %v270_v9 = vld [vmem:[#allocation5 + $0x1b8] sm:$0xff]  ;;  %v267_v10 = vld [vmem:[#allocation5 + $0x1a0] sm:$0xff]  ;;  %s671_s16 = scalar_lea.vmem %s917_s17, 256  ;;  %p984_p11 = scmp.ne.s32.totalorder %s978_s6, 0 }
  0x4c   : > { %v269_v11 = vld [vmem:[#allocation5 + $0x1b0] sm:$0xff]  ;;  %v264_v12 = vld [vmem:[#allocation5 + $0x188] sm:$0xff]  ;;  %v266_v13 = vld [vmem:[#allocation5 + $0x198] sm:$0xff]  ;;  %p672_p3 = scmp.ne.s32.totalorder %s917_s17, %s671_s16  ;;  %s745_s7 = smov [#allocation7]  }
  0x4d   : > { %v263_v14 = vld [vmem:[#allocation5 + $0x180] sm:$0xff]  ;;  %v265_v15 = vld [vmem:[#allocation5 + $0x190] sm:$0xff]  ;;  %v260_v16 = vld [vmem:[#allocation5 + $0x168] sm:$0xff]  ;;  %s675_s10 = sshll.u32 %s745_s7, 4  ;;  %s676_s10 = int_to_ptr.vmem [resolvable:$false] %s675_s10 }
  0x4e   : > { %289 = vmatpush1.xpose.msra.mxu0 %v271_v6  ;;  %364 = vmatpush1.xpose.msra.mxu1 %v273_v7  ;;  %v262_v17 = vld [vmem:[#allocation5 + $0x178] sm:$0xff]  ;;  %v259_v18 = vld [vmem:[#allocation5 + $0x160] sm:$0xff]  ;;  %v261_v19 = vld [vmem:[#allocation5 + $0x170] sm:$0xff]  ;;  %p673_p7 = pnand %p672_p3, %p984_p11  ;;  %s677_s11 = scalar_lea.vmem %s676_s10, 512 }
  0x4f   : > { %290 = vmatprep.subr.mxu0 %v268_v8  ;;  %365 = vmatprep.subr.mxu1 %v270_v9  ;;  %v256_v20 = vld [vmem:[#allocation5 + $0x148] sm:$0xff]  ;;  %v258_v21 = vld [vmem:[#allocation5 + $0x158] sm:$0xff]  ;;  %v255_v22 = vld [vmem:[#allocation5 + $0x140] sm:$0xff]  ;;  %p678_p10 = scmp.lt.s32.totalorder %s917_s17, %s676_s10  ;;  %p679_p12 = scmp.lt.s32.totalorder %s677_s11, %s671_s16 }
  0x50   : > { %v257_v23 = vld [vmem:[#allocation5 + $0x150] sm:$0xff]  ;;  %v252_v24 = vld [vmem:[#allocation5 + $0x128] sm:$0xff]  ;;  %v254_v25 = vld [vmem:[#allocation5 + $0x138] sm:$0xff]  ;;  %p674_p9 = pneg %p673_p7 }
  0x51   : > { %v208_v26 = vld [vmem:[%s894_s4 + $0x8] sm:$0xff]  ;;  %v210_v27 = vld [vmem:[%s894_s4 + $0x18] sm:$0xff]  ;;  %v251_v28 = vld [vmem:[#allocation5 + $0x120] sm:$0xff]  ;;  %p680_p13 = por %p679_p12, %p678_p10 }
  0x52   : > { %291 = vmatpush1.xpose.msra.mxu0 %v267_v10  ;;  %366 = vmatpush1.xpose.msra.mxu1 %v269_v11  ;;  %v253_v29 = vld [vmem:[#allocation5 + $0x130] sm:$0xff]  ;;  %v248_v30 = vld [vmem:[#allocation5 + $0x108] sm:$0xff]  ;;  %v250_v31 = vld [vmem:[#allocation5 + $0x118] sm:$0xff] }
  0x53   : > { %292 = vmatprep.subr.mxu0 %v264_v12  ;;  %367 = vmatprep.subr.mxu1 %v266_v13  ;;  %v247_v32 = vld [vmem:[#allocation5 + $0x100] sm:$0xff]  ;;  %v249_v33 = vld [vmem:[#allocation5 + $0x110] sm:$0xff]  ;;  %v244_v34 = vld [vmem:[#allocation5 + $0xe8] sm:$0xff]  ;;  %p681_p0 = pnand %p680_p13, %p674_p9 }
  0x54   : > { %350 = vmatprep.mubr.f32.mxu0 %v208_v26  ;;  %425 = vmatprep.mubr.f32.mxu1 %v210_v27  ;;  %v246_v35 = vld [vmem:[#allocation5 + $0xf8] sm:$0xff]  ;;  %v243_v36 = vld [vmem:[#allocation5 + $0xe0] sm:$0xff]  ;;  %v245_v37 = vld [vmem:[#allocation5 + $0xf0] sm:$0xff] }
  0x55   : > { %v240_v38 = vld [vmem:[#allocation5 + $0xc8] sm:$0xff]  ;;  %v242_v39 = vld [vmem:[#allocation5 + $0xd8] sm:$0xff]  ;;  %v239_v40 = vld [vmem:[#allocation5 + $0xc0] sm:$0xff] }
  0x56   : > { %293 = vmatpush1.xpose.msra.mxu0 %v263_v14  ;;  %368 = vmatpush1.xpose.msra.mxu1 %v265_v15  ;;  %v241_v41 = vld [vmem:[#allocation5 + $0xd0] sm:$0xff]  ;;  %v236_v42 = vld [vmem:[#allocation5 + $0xa8] sm:$0xff]  ;;  %v238_v43 = vld [vmem:[#allocation5 + $0xb8] sm:$0xff] }
  0x57   : > { %294 = vmatprep.subr.mxu0 %v260_v16  ;;  %369 = vmatprep.subr.mxu1 %v262_v17  ;;  %v235_v44 = vld [vmem:[#allocation5 + $0xa0] sm:$0xff]  ;;  %v237_v45 = vld [vmem:[#allocation5 + $0xb0] sm:$0xff]  ;;  %v232_v46 = vld [vmem:[#allocation5 + $0x88] sm:$0xff] }
  0x58   : > { %v234_v47 = vld [vmem:[#allocation5 + $0x98] sm:$0xff]  ;;  %v231_v48 = vld [vmem:[#allocation5 + $0x80] sm:$0xff]  ;;  %v233_v49 = vld [vmem:[#allocation5 + $0x90] sm:$0xff] }
  0x59   : > { %v228_v50 = vld [vmem:[#allocation5 + $0x68] sm:$0xff]  ;;  %v230_v51 = vld [vmem:[#allocation5 + $0x78] sm:$0xff]  ;;  %v227_v52 = vld [vmem:[#allocation5 + $0x60] sm:$0xff] }
  0x5a   : > { %295 = vmatpush1.xpose.msra.mxu0 %v259_v18  ;;  %370 = vmatpush1.xpose.msra.mxu1 %v261_v19  ;;  %v229_v53 = vld [vmem:[#allocation5 + $0x70] sm:$0xff]  ;;  %v224_v54 = vld [vmem:[#allocation5 + $0x48] sm:$0xff]  ;;  %v226_v55 = vld [vmem:[#allocation5 + $0x58] sm:$0xff] }
  0x5b   : > { %296 = vmatprep.subr.mxu0 %v256_v20  ;;  %371 = vmatprep.subr.mxu1 %v258_v21  ;;  %v223_v56 = vld [vmem:[#allocation5 + $0x40] sm:$0xff]  ;;  %v225_v57 = vld [vmem:[#allocation5 + $0x50] sm:$0xff]  ;;  %v220_v58 = vld [vmem:[#allocation5 + $0x28] sm:$0xff] }
  0x5c   : > { %v222_v59 = vld [vmem:[#allocation5 + $0x38] sm:$0xff]  ;;  %v219_v60 = vld [vmem:[#allocation5 + $0x20] sm:$0xff]  ;;  %v221_v61 = vld [vmem:[#allocation5 + $0x30] sm:$0xff] }
  0x5d   : > { %v216_v62 = vld [vmem:[#allocation5 + $0x8] sm:$0xff]  ;;  %v218_v63 = vld [vmem:[#allocation5 + $0x18] sm:$0xff]  ;;  %v215_v0 = vld [vmem:[#allocation5] sm:$0xff] }
  0x5e   : > { %297 = vmatpush1.xpose.msra.mxu0 %v255_v22  ;;  %372 = vmatpush1.xpose.msra.mxu1 %v257_v23  ;;  %v217_v1 = vld [vmem:[#allocation5 + $0x10] sm:$0xff]  ;;  %v207_v2 = vld [vmem:[%s894_s4] sm:$0xff]  ;;  %v212_v4 = vld [vmem:[%s894_s4 + $0x28] sm:$0xff] }
  0x5f   : > { %298 = vmatprep.subr.mxu0 %v252_v24  ;;  %373 = vmatprep.subr.mxu1 %v254_v25  ;;  %v209_v3 = vld [vmem:[%s894_s4 + $0x10] sm:$0xff]  ;;  %v214_v5 = vld [vmem:[%s894_s4 + $0x38] sm:$0xff]  ;;  %v211_v6 = vld [vmem:[%s894_s4 + $0x20] sm:$0xff] }
  0x60   : > { %v213_v7 = vld [vmem:[%s894_s4 + $0x30] sm:$0xff]  ;;  %v547_v8 = vld [vmem:[%s967_s2] ss:$0 sm:$0xff] }
  0x62   : > { %299 = vmatpush1.xpose.msra.mxu0 %v251_v28  ;;  %374 = vmatpush1.xpose.msra.mxu1 %v253_v29 }
  0x63   : > { %300 = vmatprep.subr.mxu0 %v248_v30  ;;  %375 = vmatprep.subr.mxu1 %v250_v31 }
  0x66   : > { %301 = vmatpush1.xpose.msra.mxu0 %v247_v32  ;;  %376 = vmatpush1.xpose.msra.mxu1 %v249_v33 }
  0x67   : > { %302 = vmatprep.subr.mxu0 %v244_v34  ;;  %377 = vmatprep.subr.mxu1 %v246_v35 }
  0x6a   : > { %303 = vmatpush1.xpose.msra.mxu0 %v243_v36  ;;  %378 = vmatpush1.xpose.msra.mxu1 %v245_v37 }
  0x6b   : > { %304 = vmatprep.subr.mxu0 %v240_v38  ;;  %379 = vmatprep.subr.mxu1 %v242_v39 }
  0x6e   : > { %305 = vmatpush1.xpose.msra.mxu0 %v239_v40  ;;  %380 = vmatpush1.xpose.msra.mxu1 %v241_v41 }
  0x6f   : > { %306 = vmatprep.subr.mxu0 %v236_v42  ;;  %381 = vmatprep.subr.mxu1 %v238_v43 }
  0x72   : > { %307 = vmatpush1.xpose.msra.mxu0 %v235_v44  ;;  %382 = vmatpush1.xpose.msra.mxu1 %v237_v45 }
  0x73   : > { %308 = vmatprep.subr.mxu0 %v232_v46  ;;  %383 = vmatprep.subr.mxu1 %v234_v47 }
  0x76   : > { %309 = vmatpush1.xpose.msra.mxu0 %v231_v48  ;;  %384 = vmatpush1.xpose.msra.mxu1 %v233_v49 }
  0x77   : > { %310 = vmatprep.subr.mxu0 %v228_v50  ;;  %385 = vmatprep.subr.mxu1 %v230_v51 }
  0x7a   : > { %311 = vmatpush1.xpose.msra.mxu0 %v227_v52  ;;  %386 = vmatpush1.xpose.msra.mxu1 %v229_v53 }
  0x7b   : > { %312 = vmatprep.subr.mxu0 %v224_v54  ;;  %387 = vmatprep.subr.mxu1 %v226_v55 }
  0x7e   : > { %313 = vmatpush1.xpose.msra.mxu0 %v223_v56  ;;  %388 = vmatpush1.xpose.msra.mxu1 %v225_v57 }
  0x7f   : > { %314 = vmatprep.subr.mxu0 %v220_v58  ;;  %389 = vmatprep.subr.mxu1 %v222_v59 }
  0x82   : > { %315 = vmatpush1.xpose.msra.mxu0 %v219_v60  ;;  %390 = vmatpush1.xpose.msra.mxu1 %v221_v61 }
  0x83   : > { %316 = vmatprep.subr.mxu0 %v216_v62  ;;  %391 = vmatprep.subr.mxu1 %v218_v63 }
  0x86   : > { %317 = vmatpush1.xpose.msra.mxu0 %v215_v0  ;;  %392 = vmatpush1.xpose.msra.mxu1 %v217_v1 }
  0x89   : > { %351 = vmatmul.mubr.f32.vlgmr.msra.gmra.mxu0 %v207_v2  ;;  %426 = vmatmul.mubr.f32.vlgmr.msra.gmra.mxu1 %v209_v3 }
  0x8a   : > { %355 = vmatprep.mubr.f32.mxu0 %v212_v4  ;;  %430 = vmatprep.mubr.f32.mxu1 %v214_v5 }
  0x8d   : > { %356 = vmatmul.mubr.f32.gmra.mxu0 %v211_v6  ;;  %431 = vmatmul.mubr.f32.gmra.mxu1 %v213_v7 }
 0x149   : > { %v352_v9 = vpop.f32.mrf.mxu0  ;;  %v427_v10 = vpop.f32.mrf.mxu1 }
 0x14a   : > { %v353_v11 = vadd.f32 %v547_v8, %v352_v9 }
 0x14b   : > { %v354_v12 = vpop.f32.mrf.mxu0  ;;  %v429_v13 = vpop.f32.mrf.mxu1 }
 0x14c   : > { %v428_v14 = vadd.f32 %v427_v10, %v353_v11 }
 0x14d   : > { %v357_v15 = vpop.f32.mrf.mxu0  ;;  %v432_v16 = vpop.f32.mrf.mxu1 }
 0x14e   : > { %436 = vst [vmem:[%s204_s29] sm:$0xff] %v428_v14  ;;  %v358_v17 = vadd.f32 %v547_v8, %v357_v15 }
 0x14f   : > { %v359_v18 = vpop.f32.mrf.mxu0  ;;  %v434_v19 = vpop.f32.mrf.mxu1 }
 0x150   : > { %v433_v20 = vadd.f32 %v432_v16, %v358_v17 }
 0x152   : > { %437 = vst [vmem:[%s204_s29 + $0x8] sm:$0xff] %v433_v20 }
 0x153   : > { %684 = shalt.err (!%p681_p0)
}
 0x154   : > { %s685_s21 = scalar_lea.hbm %s922_s8, 256  ;;  %s689_s4 = scalar_lea.hbm %s968_s3, 512 }
 0x155   : > { %p686_p5 = scmp.ne.s32.totalorder %s922_s8, %s685_s21  ;;  %p690_p4 = scmp.lt.s32.totalorder %s922_s8, %s968_s3 }
 0x156   : > { %p691_p6 = scmp.lt.s32.totalorder %s689_s4, %s685_s21 }
 0x157   : > { %p687_p2 = pnand %p686_p5, %p984_p11 }
 0x158   : > { %p692_p8 = por %p691_p6, %p690_p4 }
 0x159   : > { %p688_p1 = pneg %p687_p2 }
 0x15b   : > { %p693_p3 = pnand %p692_p8, %p688_p1 }
 0x15d   : > { %696 = shalt.err (!%p693_p3)
}
 0x15e   : > { %s746_s28 = smov 128   ;;  %s747_s29 = smov 8  }
 0x15f   : > { %562 = dma.vmem_to_hbm [thread:$0]  (%p984_p11), %s917_s17, 256, %s922_s8, %s439_s9, %s746_s28, %s746_s28, %s747_s29  }
 0x160 PF: > { %s467_s22 = sand.u32 1, %s727_s12   ;;  %p985_p7 = scmp.ne.s32.totalorder %s974_s19, 0 }
 0x161   : > { %p986_p9 = scmp.ge.s32.totalorder %s739_s15, 2  ;;  %s468_s23 = scalar_lea.sflag [#allocation4], %s467_s22 }
 0x163   : > { %p573_p10 = pnand %p986_p9, %p985_p7 }
 0x165   : > { %p574_p12 = pneg %p573_p10 }
 0x167   : > { %722 = dma.done.wait (%p574_p12), %s468_s23, 256  }
 0x168   : > { %724 = vsyncadd (%p574_p12), %s468_s23, 4294967040  ;;  %p17_p13 = scmp.ge.s32.totalorder %s822_s24, 4   ;;  %s987_s12 = smov %s731_s13 }
 0x169   : > { %s988_s13 = smov %s735_s14  ;;  %s989_s14 = smov %s842_s5 }
 0x16a   : > { %s990_s15 = smov %s822_s24  ;;  %19 = sbr.rel (!%p17_p13) target bundleno = 6 (0x6), region = 81 }
 0x16f   :  { %473 = vsyncpa [#allocation3], 1 }
 0x170   :  { %475 = vsyncpa [#allocation3 + $0x1], 1 }
 0x171   :  { %476 = vsyncpa [#allocation6], 1 }
 0x172   :  { %477 = vsyncpa [#allocation4], 1 }
 0x173   :  { %479 = vsyncpa [#allocation4 + $0x1], 1 }

</bundles_post_ra>
